<compile_context>
chip_gen: v7x
topology: tpu7x:2x2x1
jax: 0.10.0
libtpu: 0.0.40
codegen_flags: <defaults>
</compile_context>

<pallas_src>
import functools

import jax
import jax.numpy as jnp
from jax.experimental import pallas as pl
from jax.experimental.pallas import tpu as pltpu

_VMEM_LIMIT = 48 * 1024 * 1024  # headroom under v7x's 64 MiB, raises v5e's 16 MiB default


def _round_up(v, m):
    return -(-v // m) * m


def _pick_tile(dim, cap, mult):
    """Largest tile <= cap that divides dim (multiple of `mult`); full dim if none."""
    if dim <= cap:
        return dim
    t = (cap // mult) * mult
    while t >= mult:
        if dim % t == 0:
            return t
        t -= mult
    return dim  # fallback: whole axis in one block (still satisfies tiling rules)


# ----------------------------------------------------------------------------
# Pallas kernels
# ----------------------------------------------------------------------------
def _matmul_kernel(x_ref, w_ref, b_ref, o_ref, acc_ref, *, relu):
    """Tiled y = x @ w + b (optional ReLU). bf16 MXU inputs, f32 accumulator."""
    @pl.when(pl.program_id(2) == 0)
    def _():
        acc_ref[...] = jnp.zeros_like(acc_ref)

    acc_ref[...] += jnp.dot(x_ref[...], w_ref[...],
                            preferred_element_type=jnp.float32)

    @pl.when(pl.program_id(2) == pl.num_programs(2) - 1)
    def _():
        y = acc_ref[...] + b_ref[...]
        if relu:
            y = jnp.maximum(y, 0.0)
        o_ref[...] = y.astype(o_ref.dtype)


def _linear_res_ln_kernel(x_ref, w_ref, b_ref, res_ref, g_ref, beta_ref, o_ref,
                          acc_ref, *, eps):
    """Fused LayerNorm(x @ w + b + residual). K tiled, f32 accumulator / LN math."""
    @pl.when(pl.program_id(1) == 0)
    def _():
        acc_ref[...] = jnp.zeros_like(acc_ref)

    acc_ref[...] += jnp.dot(x_ref[...], w_ref[...],
                            preferred_element_type=jnp.float32)

    @pl.when(pl.program_id(1) == pl.num_programs(1) - 1)
    def _():
        y = acc_ref[...] + b_ref[...] + res_ref[...].astype(jnp.float32)
        mu = jnp.mean(y, axis=-1, keepdims=True)
        var = jnp.mean((y - mu) ** 2, axis=-1, keepdims=True)
        o_ref[...] = (((y - mu) * jax.lax.rsqrt(var + eps)) * g_ref[...]
                      + beta_ref[...]).astype(o_ref.dtype)


def _flash_attention_kernel(*refs, has_mask, causal, tq, tk):
    """Online-softmax attention, grid (B, H, Sq_blk, Sk_blk), Sk innermost."""
    if has_mask:
        q_ref, k_ref, v_ref, mask_ref, o_ref, m_sc, l_sc, acc_sc = refs
    else:
        q_ref, k_ref, v_ref, o_ref, m_sc, l_sc, acc_sc = refs
    ki = pl.program_id(3)

    @pl.when(ki == 0)
    def _():
        m_sc[...] = jnp.full_like(m_sc, -jnp.inf)
        l_sc[...] = jnp.zeros_like(l_sc)
        acc_sc[...] = jnp.zeros_like(acc_sc)

    q = q_ref[0]                                            # [tq, Dhp] bf16
    k = k_ref[0]                                            # [tk, Dhp] bf16
    # q @ k^T via contracting dims (no transpose), f32 scores. Scale is folded into Wq.
    s = jax.lax.dot_general(q, k, (((1,), (1,)), ((), ())),
                            preferred_element_type=jnp.float32)   # [tq, tk]
    if has_mask:
        s = s + mask_ref[0]                                 # additive 0 / -1e9
    if causal:
        rows = pl.program_id(2) * tq + jax.lax.broadcasted_iota(jnp.int32, (tq, tk), 0)
        cols = ki * tk + jax.lax.broadcasted_iota(jnp.int32, (tq, tk), 1)
        s = jnp.where(cols <= rows, s, -1e9)

    m_prev = m_sc[...]
    m_new = jnp.maximum(m_prev, jnp.max(s, axis=-1, keepdims=True))
    alpha = jnp.exp(m_prev - m_new)
    p = jnp.exp(s - m_new)
    l_sc[...] = alpha * l_sc[...] + jnp.sum(p, axis=-1, keepdims=True)
    acc_sc[...] = alpha * acc_sc[...] + jnp.dot(p.astype(jnp.bfloat16), v_ref[0],
                                                preferred_element_type=jnp.float32)
    m_sc[...] = m_new

    @pl.when(ki == pl.num_programs(3) - 1)
    def _():
        o_ref[0] = (acc_sc[...] * pl.reciprocal(l_sc[...])).astype(o_ref.dtype)


# ----------------------------------------------------------------------------
# Pallas wrappers
# ----------------------------------------------------------------------------
def pallas_linear(x, w, b, relu=False, out_dtype=jnp.bfloat16):
    """x:[M,K] bf16, w:[K,N] bf16, b:[N] f32 -> [M,N] out_dtype. Tiled (M,N,K)."""
    if x.dtype != jnp.bfloat16:
        x = x.astype(jnp.bfloat16)
    M, K = x.shape
    N = w.shape[1]
    tm = _pick_tile(M, 512, 8)
    tn = _pick_tile(N, 512, 128)
    tk = _pick_tile(K, 1024, 128)
    # make sure both v7x TensorCores get work
    if (M // tm) * (N // tn) == 1 and tm >= 16 and (tm // 2) % 8 == 0:
        tm //= 2
    grid = (M // tm, N // tn, K // tk)
    return pl.pallas_call(
        functools.partial(_matmul_kernel, relu=relu),
        out_shape=jax.ShapeDtypeStruct((M, N), out_dtype),
        grid=grid,
        in_specs=[pl.BlockSpec((tm, tk), lambda i, j, k: (i, k)),
                  pl.BlockSpec((tk, tn), lambda i, j, k: (k, j)),
                  pl.BlockSpec((1, tn), lambda i, j, k: (0, j))],
        out_specs=pl.BlockSpec((tm, tn), lambda i, j, k: (i, j)),
        scratch_shapes=[pltpu.VMEM((tm, tn), jnp.float32)],
        compiler_params=pltpu.CompilerParams(
            dimension_semantics=("parallel", "parallel", "arbitrary"),
            vmem_limit_bytes=_VMEM_LIMIT),
    )(x, w, b.astype(jnp.float32).reshape(1, N))


def pallas_linear_res_ln(x, w, b, res, gamma, beta, eps=1e-5, out_dtype=jnp.bfloat16):
    """Fused out-projection + residual + LayerNorm. x:[M,K] bf16, w:[K,D], res:[M,D]."""
    if x.dtype != jnp.bfloat16:
        x = x.astype(jnp.bfloat16)
    M, K = x.shape
    D = w.shape[1]
    tm = _pick_tile(M, 256, 8)
    tk = _pick_tile(K, 512, 128)
    if M // tm == 1 and tm >= 16 and (tm // 2) % 8 == 0:
        tm //= 2
    grid = (M // tm, K // tk)
    return pl.pallas_call(
        functools.partial(_linear_res_ln_kernel, eps=eps),
        out_shape=jax.ShapeDtypeStruct((M, D), out_dtype),
        grid=grid,
        in_specs=[pl.BlockSpec((tm, tk), lambda i, k: (i, k)),
                  pl.BlockSpec((tk, D), lambda i, k: (k, 0)),
                  pl.BlockSpec((1, D), lambda i, k: (0, 0)),
                  pl.BlockSpec((tm, D), lambda i, k: (i, 0)),
                  pl.BlockSpec((1, D), lambda i, k: (0, 0)),
                  pl.BlockSpec((1, D), lambda i, k: (0, 0))],
        out_specs=pl.BlockSpec((tm, D), lambda i, k: (i, 0)),
        scratch_shapes=[pltpu.VMEM((tm, D), jnp.float32)],
        compiler_params=pltpu.CompilerParams(
            dimension_semantics=("parallel", "arbitrary"),
            vmem_limit_bytes=_VMEM_LIMIT),
    )(x, w, b.astype(jnp.float32).reshape(1, D), res.astype(jnp.bfloat16),
      gamma.astype(jnp.float32).reshape(1, D), beta.astype(jnp.float32).reshape(1, D))


def pallas_mha(q_buf, kv_buf, *, num_heads, dh_p, q_off, k_off, v_off,
               mask=None, causal=False, out_dtype=jnp.bfloat16):
    """Multi-head attention reading head slices directly from fused projections.

    q_buf : [B, Sq, *]  bf16 (Q columns start at q_off, head-major, dh_p per head)
    kv_buf: [B, Sk, *]  bf16 (K at k_off, V at v_off)
    mask  : optional additive mask [B, Sq, Sk] f32 (0 keep / -1e9 masked)
    causal: generate the causal mask in-kernel (no mask DMA)
    Output: [B, Sq, num_heads * dh_p] out_dtype (head-major, lane-dense).
    """
    B, Sq, _ = q_buf.shape
    Sk = kv_buf.shape[1]
    tq = _pick_tile(Sq, 256, 8)
    tk = _pick_tile(Sk, 128, 128)
    qo, ko, vo = q_off // dh_p, k_off // dh_p, v_off // dh_p
    has_mask = mask is not None

    in_specs = [pl.BlockSpec((1, tq, dh_p), lambda b, h, qi, ki: (b, qi, h + qo)),
                pl.BlockSpec((1, tk, dh_p), lambda b, h, qi, ki: (b, ki, h + ko)),
                pl.BlockSpec((1, tk, dh_p), lambda b, h, qi, ki: (b, ki, h + vo))]
    args = [q_buf, kv_buf, kv_buf]
    if has_mask:
        in_specs.append(pl.BlockSpec((1, tq, tk), lambda b, h, qi, ki: (b, qi, ki)))
        args.append(mask)

    return pl.pallas_call(
        functools.partial(_flash_attention_kernel, has_mask=has_mask,
                          causal=causal, tq=tq, tk=tk),
        out_shape=jax.ShapeDtypeStruct((B, Sq, num_heads * dh_p), out_dtype),
        grid=(B, num_heads, Sq // tq, Sk // tk),
        in_specs=in_specs,
        out_specs=pl.BlockSpec((1, tq, dh_p), lambda b, h, qi, ki: (b, qi, h)),
        scratch_shapes=[pltpu.VMEM((tq, 1), jnp.float32),
                        pltpu.VMEM((tq, 1), jnp.float32),
                        pltpu.VMEM((tq, dh_p), jnp.float32)],
        compiler_params=pltpu.CompilerParams(
            dimension_semantics=("parallel", "parallel", "parallel", "arbitrary"),
            vmem_limit_bytes=_VMEM_LIMIT),
    )(*args)


# ----------------------------------------------------------------------------
# Model glue (embedding / positional encoding / free reshapes in plain JAX)
# ----------------------------------------------------------------------------
def sinusoidal_positional_encoding(max_seq_len, d_model):
    pos = jnp.arange(max_seq_len, dtype=jnp.float32)[:, None]
    i = jnp.arange(d_model, dtype=jnp.float32)[None, :]
    angle_rates = 1.0 / jnp.power(10000.0, (2.0 * jnp.floor(i / 2.0)) / d_model)
    angles = pos * angle_rates
    pe = jnp.where(jnp.mod(jnp.arange(d_model), 2) == 0,
                   jnp.sin(angles), jnp.cos(angles))
    return pe  # [max_seq_len, d_model]


def init_decoder_params(key, vocab, d_model, num_layers, num_ff, num_heads):
    Dh = d_model // num_heads
    Dh_p = _round_up(Dh, 128)            # lane-dense head dim
    Dp = num_heads * Dh_p
    scale = 1.0 / float(Dh) ** 0.5
    n_ff = _round_up(num_ff, 128)        # FF hidden padded end-to-end (zeros)
    n_v = _round_up(vocab, 128)          # logits padded, sliced back at the end

    def dense(k, fan_in, fan_out):
        return 0.02 * jax.random.normal(k, (fan_in, fan_out), jnp.float32)

    def head_pad_cols(w):                # (K, H*Dh) -> (K, H*Dh_p), per-head zero pad
        K = w.shape[0]
        w = w.reshape(K, num_heads, Dh)
        return jnp.pad(w, ((0, 0), (0, 0), (0, Dh_p - Dh))).reshape(K, Dp)

    def head_pad_rows(w):                # (H*Dh, N) -> (H*Dh_p, N)
        N = w.shape[1]
        w = w.reshape(num_heads, Dh, N)
        return jnp.pad(w, ((0, 0), (0, Dh_p - Dh), (0, 0))).reshape(Dp, N)

    def pad_cols(w, n):
        return jnp.pad(w, ((0, 0), (0, n - w.shape[1])))

    def pad_rows(w, n):
        return jnp.pad(w, ((0, n - w.shape[0]), (0, 0)))

    keys = jax.random.split(key, 2 + num_layers)
    params = {
        "embedding": 0.02 * jax.random.normal(keys[0], (vocab, d_model), jnp.float32),
        "fc_out_w": pad_cols(dense(keys[1], d_model, vocab), n_v).astype(jnp.bfloat16),
        "fc_out_b": jnp.zeros((n_v,), jnp.float32),
        "layers": [],
    }
    for l in range(num_layers):
        lk = jax.random.split(keys[2 + l], 10)
        sa_wq, sa_wk, sa_wv = (dense(lk[i], d_model, d_model) for i in range(3))
        ca_wq, ca_wk, ca_wv = (dense(lk[i], d_model, d_model) for i in range(4, 7))
        layer = {
            # self-attention: fused head-padded QKV, 1/sqrt(Dh) folded into Wq
            "sa_wqkv": jnp.concatenate([head_pad_cols(sa_wq * scale),
                                        head_pad_cols(sa_wk),
                                        head_pad_cols(sa_wv)], axis=1).astype(jnp.bfloat16),
            "sa_bqkv": jnp.zeros((3 * Dp,), jnp.float32),
            "sa_wo": head_pad_rows(dense(lk[3], d_model, d_model)).astype(jnp.bfloat16),
            "sa_bo": jnp.zeros((d_model,), jnp.float32),
            # cross-attention: Q from decoder (scale folded), fused KV from encoder
            "ca_wq": head_pad_cols(ca_wq * scale).astype(jnp.bfloat16),
            "ca_bq": jnp.zeros((Dp,), jnp.float32),
            "ca_wkv": jnp.concatenate([head_pad_cols(ca_wk),
                                       head_pad_cols(ca_wv)], axis=1).astype(jnp.bfloat16),
            "ca_bkv": jnp.zeros((2 * Dp,), jnp.float32),
            "ca_wo": head_pad_rows(dense(lk[7], d_model, d_model)).astype(jnp.bfloat16),
            "ca_bo": jnp.zeros((d_model,), jnp.float32),
            # feed-forward (hidden padded to 128 lanes, padded units stay exactly zero)
            "ff_w1": pad_cols(dense(lk[8], d_model, num_ff), n_ff).astype(jnp.bfloat16),
            "ff_b1": jnp.zeros((n_ff,), jnp.float32),
            "ff_w2": pad_rows(dense(lk[9], num_ff, d_model), n_ff).astype(jnp.bfloat16),
            "ff_b2": jnp.zeros((d_model,), jnp.float32),
            # layer norms (f32)
            "ln1_g": jnp.ones((d_model,), jnp.float32), "ln1_b": jnp.zeros((d_model,), jnp.float32),
            "ln2_g": jnp.ones((d_model,), jnp.float32), "ln2_b": jnp.zeros((d_model,), jnp.float32),
            "ln3_g": jnp.ones((d_model,), jnp.float32), "ln3_b": jnp.zeros((d_model,), jnp.float32),
        }
        params["layers"].append(layer)
    return params


def decoder_block(x2d, enc2d, add_mask, causal, p, B, St, Se, H, Dh_p):
    Dp = H * Dh_p
    # --- masked self-attention: fused QKV -> flash attention -> fused Wo+res+LN ---
    qkv = pallas_linear(x2d, p["sa_wqkv"], p["sa_bqkv"])            # [B*St, 3*Dp] bf16
    qkv3 = qkv.reshape(B, St, 3 * Dp)                               # free reshape
    attn = pallas_mha(qkv3, qkv3, num_heads=H, dh_p=Dh_p,
                      q_off=0, k_off=Dp, v_off=2 * Dp,
                      mask=add_mask, causal=causal)                 # [B, St, Dp] bf16
    x2d = pallas_linear_res_ln(attn.reshape(B * St, Dp), p["sa_wo"], p["sa_bo"],
                               x2d, p["ln1_g"], p["ln1_b"])

    # --- cross-attention: Q from decoder, fused KV from encoder, unmasked ---
    q3 = pallas_linear(x2d, p["ca_wq"], p["ca_bq"]).reshape(B, St, Dp)
    kv3 = pallas_linear(enc2d, p["ca_wkv"], p["ca_bkv"]).reshape(B, Se, 2 * Dp)
    attn = pallas_mha(q3, kv3, num_heads=H, dh_p=Dh_p,
                      q_off=0, k_off=0, v_off=Dp, mask=None, causal=False)
    x2d = pallas_linear_res_ln(attn.reshape(B * St, Dp), p["ca_wo"], p["ca_bo"],
                               x2d, p["ln2_g"], p["ln2_b"])

    # --- position-wise feed-forward: ReLU fused into matmul1, matmul2 fused w/ res+LN ---
    h = pallas_linear(x2d, p["ff_w1"], p["ff_b1"], relu=True)
    x2d = pallas_linear_res_ln(h, p["ff_w2"], p["ff_b2"], x2d,
                               p["ln3_g"], p["ln3_b"])
    return x2d


def decoder_forward(params, target, target_mask, encoded, d_model, num_heads, vocab,
                    mask_is_causal=False):
    B, St = target.shape
    Se = encoded.shape[1]
    H = num_heads
    Dh_p = _round_up(d_model // H, 128)

    # word embedding (gather) + sinusoidal positional encoding — glue in JAX.
    # TODO(synk): embedding lookup stays a plain-JAX gather (no clean Pallas win).
    pe = sinusoidal_positional_encoding(St, d_model)
    x = jnp.take(params["embedding"], target, axis=0) + pe[None, :, :]
    x2d = x.reshape(B * St, d_model).astype(jnp.bfloat16)
    enc2d = encoded.reshape(B * Se, d_model).astype(jnp.bfloat16)

    # Self-attention mask: either generated in-kernel (causal fast path, no DMA)
    # or an additive 0 / -1e9 tensor built from the provided target_mask.
    add_mask = None
    if not mask_is_causal:
        add_mask = jnp.where(target_mask.reshape(B, St, St) > 0,
                             0.0, -1e9).astype(jnp.float32)

    for p in params["layers"]:
        x2d = decoder_block(x2d, enc2d, add_mask, mask_is_causal, p, B, St, Se, H, Dh_p)

    logits = pallas_linear(x2d, params["fc_out_w"], params["fc_out_b"],
                           out_dtype=jnp.float32)
    return logits[:, :vocab].reshape(B, St, vocab)


# ----------------------------------------------------------------------------
if __name__ == "__main__":
    # small, decoder-consistent shapes
    target_vocab_size = 50
    d_model = 32
    num_layers = 2
    max_seq_len = 16
    num_heads = 4
    num_ff_hidden_units = 64
    batch = 2
    seq = 8

    root = jax.random.PRNGKey(0)
    k_param, k_tgt, k_enc = jax.random.split(root, 3)

    params = init_decoder_params(k_param, target_vocab_size, d_model,
                                 num_layers, num_ff_hidden_units, num_heads)

    target = jax.random.randint(k_tgt, (batch, seq), 0, target_vocab_size,
                                dtype=jnp.int32)
    encoded = jax.random.normal(k_enc, (batch, seq, d_model), jnp.float32)
    # causal target mask: 1 = attend, 0 = masked
    causal = jnp.tril(jnp.ones((seq, seq), jnp.float32))
    target_mask = jnp.broadcast_to(causal[None, None, :, :], (batch, 1, seq, seq))

    # fast path: in-kernel causal mask (no mask DMA)
    out_causal = decoder_forward(params, target, target_mask, encoded,
                                 d_model, num_heads, target_vocab_size,
                                 mask_is_causal=True)
    # general path: DMA'd additive mask built from target_mask (module semantics)
    out_masked = decoder_forward(params, target, target_mask, encoded,
                                 d_model, num_heads, target_vocab_size,
                                 mask_is_causal=False)
    out_causal, out_masked = jax.block_until_ready((out_causal, out_masked))

    assert out_causal.shape == (batch, seq, target_vocab_size), out_causal.shape
    assert out_masked.shape == (batch, seq, target_vocab_size), out_masked.shape
    assert bool(jnp.all(jnp.isfinite(out_causal)))
    assert bool(jnp.all(jnp.isfinite(out_masked)))
    assert bool(jnp.allclose(out_causal, out_masked, atol=3e-2, rtol=3e-2))
    print("KERNEL_OK")
</pallas_src>

<mosaic_0001>
module attributes {stable_mosaic.version = 11 : i64} {
  func.func @_matmul_kernel(%arg0: i32, %arg1: i32, %arg2: i32, %arg3: memref<16x32xbf16, #tpu.memory_space<vmem>>, %arg4: memref<32x512xbf16, #tpu.memory_space<vmem>>, %arg5: memref<1x512xf32, #tpu.memory_space<vmem>>, %arg6: memref<16x512xbf16, #tpu.memory_space<vmem>>, %arg7: memref<16x512xf32, #tpu.memory_space<vmem>>) attributes {dimension_semantics = [#tpu.dimension_semantics<parallel>, #tpu.dimension_semantics<parallel>, #tpu.dimension_semantics<arbitrary>], iteration_bounds = array<i64: 1, 3, 1>, scalar_prefetch = 0 : i64, scratch_operands = 1 : i64, tpu.core_type = #tpu.core_type<tc>, window_params = [{transform_indices = @transform_0, window_bounds = array<i64: 16, 32>}, {transform_indices = @transform_1, window_bounds = array<i64: 32, 512>}, {transform_indices = @transform_2, window_bounds = array<i64: 1, 512>}, {transform_indices = @transform_3, window_bounds = array<i64: 16, 512>}]} {
    %c0_i32 = arith.constant 0 : i32
    %0 = arith.cmpi eq, %arg2, %c0_i32 : i32
    %1 = arith.extui %0 : i1 to i32
    %c0_i32_0 = arith.constant 0 : i32
    %2 = arith.cmpi ne, %1, %c0_i32_0 : i32
    scf.if %2 {
      %cst_10 = arith.constant 0.000000e+00 : f32
      %12 = vector.broadcast %cst_10 : f32 to vector<16x512xf32>
      %c0_11 = arith.constant 0 : index
      %c0_12 = arith.constant 0 : index
      %13 = vector.load %arg7[%c0_11, %c0_12] : memref<16x512xf32, #tpu.memory_space<vmem>>, vector<16x512xf32>
      tpu.vector_store %arg7[%c0_11, %c0_12], %12 {strides = array<i32>} : memref<16x512xf32, #tpu.memory_space<vmem>>, vector<16x512xf32>,
    } else {
    }
    %c0 = arith.constant 0 : index
    %c0_1 = arith.constant 0 : index
    %3 = vector.load %arg7[%c0, %c0_1] : memref<16x512xf32, #tpu.memory_space<vmem>>, vector<16x512xf32>
    %c0_2 = arith.constant 0 : index
    %c0_3 = arith.constant 0 : index
    %4 = vector.load %arg3[%c0_2, %c0_3] : memref<16x32xbf16, #tpu.memory_space<vmem>>, vector<16x32xbf16>
    %c0_4 = arith.constant 0 : index
    %c0_5 = arith.constant 0 : index
    %5 = vector.load %arg4[%c0_4, %c0_5] : memref<32x512xbf16, #tpu.memory_space<vmem>>, vector<32x512xbf16>
    %cst = arith.constant dense<0.000000e+00> : vector<16x512xf32>
    %6 = tpu.matmul %4, %5, %cst {dimension_numbers = #tpu.dot_dimension_numbers<[1], [0], [0], [1], [0, 0, 1, 1], [], []>} : vector<16x32xbf16>, vector<32x512xbf16>, vector<16x512xf32> -> vector<16x512xf32>
    %7 = arith.addf %3, %6 : vector<16x512xf32>
    %c0_6 = arith.constant 0 : index
    %c0_7 = arith.constant 0 : index
    %8 = vector.load %arg7[%c0_6, %c0_7] : memref<16x512xf32, #tpu.memory_space<vmem>>, vector<16x512xf32>
    tpu.vector_store %arg7[%c0_6, %c0_7], %7 {strides = array<i32>} : memref<16x512xf32, #tpu.memory_space<vmem>>, vector<16x512xf32>,
    %c0_i32_8 = arith.constant 0 : i32
    %9 = arith.cmpi eq, %arg2, %c0_i32_8 : i32
    %10 = arith.extui %9 : i1 to i32
    %c0_i32_9 = arith.constant 0 : i32
    %11 = arith.cmpi ne, %10, %c0_i32_9 : i32
    scf.if %11 {
      %c0_10 = arith.constant 0 : index
      %c0_11 = arith.constant 0 : index
      %12 = vector.load %arg7[%c0_10, %c0_11] : memref<16x512xf32, #tpu.memory_space<vmem>>, vector<16x512xf32>
      %c0_12 = arith.constant 0 : index
      %c0_13 = arith.constant 0 : index
      %13 = vector.load %arg5[%c0_12, %c0_13] : memref<1x512xf32, #tpu.memory_space<vmem>>, vector<1x512xf32>
      %14 = vector.broadcast %13 : vector<1x512xf32> to vector<16x512xf32>
      %15 = arith.addf %12, %14 : vector<16x512xf32>
      %16 = arith.truncf %15 : vector<16x512xf32> to vector<16x512xbf16>
      %c0_14 = arith.constant 0 : index
      %c0_15 = arith.constant 0 : index
      %17 = vector.load %arg6[%c0_14, %c0_15] : memref<16x512xbf16, #tpu.memory_space<vmem>>, vector<16x512xbf16>
      tpu.vector_store %arg6[%c0_14, %c0_15], %16 {strides = array<i32>} : memref<16x512xbf16, #tpu.memory_space<vmem>>, vector<16x512xbf16>,
    } else {
    }
    return
  }
  func.func @transform_0(%arg0: i32, %arg1: i32, %arg2: i32) -> (i32, i32) {
    %c0_i32 = arith.constant 0 : i32
    return %arg0, %arg2 : i32, i32
  }
  func.func @transform_1(%arg0: i32, %arg1: i32, %arg2: i32) -> (i32, i32) {
    %c0_i32 = arith.constant 0 : i32
    return %arg2, %arg1 : i32, i32
  }
  func.func @transform_2(%arg0: i32, %arg1: i32, %arg2: i32) -> (i32, i32) {
    %c0_i32 = arith.constant 0 : i32
    %c0_i32_0 = arith.constant 0 : i32
    return %c0_i32, %arg1 : i32, i32
  }
  func.func @transform_3(%arg0: i32, %arg1: i32, %arg2: i32) -> (i32, i32) {
    %c0_i32 = arith.constant 0 : i32
    return %arg0, %arg1 : i32, i32
  }
}

</mosaic_0001>

<bundles_post_ra>
// kernel: tpu_custom_call.1
= control target key start
LH: loop header
LB: loop body
LE: loop exit
PB: predicated region body
PF: predicated region fallthrough
CT: control target
= control target key end

     0   :  { %s1285_s0 = inlined_call_operand.hbm [shape: bf16[16,32], index: 0, kind: input, shape index: {}]   ;;  %s1286_s1 = inlined_call_operand.hbm [shape: bf16[32,1536], index: 1, kind: input, shape index: {}]   ;;  %s1287_s2 = inlined_call_operand.hbm [shape: f32[1,1536], index: 2, kind: input, shape index: {}]   ;;  %s1288_s3 = inlined_call_operand.hbm [shape: bf16[16,1536], index: 3, kind: output, shape index: {}]  }
   0x1   :  { %1297 = sst [smem:[#allocation14_spill]] %s1286_s1 }
   0x2   :  { %8 = vsyncpa [#allocation4], 0 }
   0x3   :  { %9 = vsyncpa [#allocation7], 0 }
   0x4   :  { %11 = vsyncpa [#allocation7 + $0x1], 0 }
   0x5   :  { %12 = vsyncpa [#allocation5], 0 }
   0x6   :  { %14 = vsyncpa [#allocation5 + $0x1], 0  ;;  %s1028_s12 = smov 0   ;;  %s1030_s13 = smov 0  }
   0x7   :  { %s1032_s14 = smov 0   ;;  %s1034_s15 = smov 0  }
   0x8   :  { %s1036_s16 = smov 0   ;;  %s1038_s17 = smov 0  }
   0x9 LB: > { %s35_s18 = sadd.s32 1, %s989_s16  ;;  %s76_s19 = sadd.s32 1, %s981_s14  ;;  %s993_s17 = sphi %s1038_s17, %s20_s17   ;;  %s989_s16 = sphi %s1036_s16, %s1320_s16   ;;  %s985_s15 = sphi %s1034_s15, %s1319_s15   ;;  %s981_s14 = sphi %s1032_s14, %s1318_s14   ;;  %s977_s13 = sphi %s1030_s13, %s1317_s13   ;;  %s973_s12 = sphi %s1028_s12, %s1316_s12  }
   0xa   : > { %p37_p0 = scmp.ge.s32.totalorder %s35_s18, 3  ;;  %p83_p1 = scmp.ne.s32.totalorder %s981_s14, %s977_s13 }
   0xb   : > { %p84_p2 = scmp.eq.s32.totalorder %s993_s17, 0  ;;  %p745_p4 = scmp.lt.s32.totalorder %s993_s17, 3 }
   0xc   : > { %s1322_s18 = smov (%p37_p0, %s35_s18), 0  ;;  %s184_s21 = sand.u32 1, %s993_s17  }
   0xd   : > { %1298 = sst [smem:[#allocation13_spill]] %s1322_s18  ;;  %p85_p3 = por %p84_p2, %p83_p1 }
   0xe   : > { %s72_s20 = ssub.s32 %s989_s16, %s1322_s18  ;;  %s186_s22 = sand.u32 1, %s981_s14  }
   0xf   : > { %p74_p5 = scmp.eq.s32.totalorder %s72_s20, 0  ;;  %s712_s23 = sshll.u32 %s989_s16, 8 }
  0x10   : > { %s681_s25 = sshll.u32 %s186_s22, 6  ;;  %s1299_s1 = sld [smem:[#allocation14_spill]] }
  0x11   : > { %s1075_s24 = scalar_select %p74_p5, %s981_s14, %s76_s19  }
  0x12   : > { %p1084_p6 = pnand %p745_p4, %p85_p3  ;;  %s188_s30 = scalar_lea.vmem [#allocation6], %s681_s25 }
  0x13   : > { %s198_s4 = sshll.u32 %s188_s30, 4  ;;  %s1090_s5 = scalar_lea.sflag [#allocation7], %s184_s21  ;;  %s1088_s4 = int_to_ptr.vmem [resolvable:$true] %s198_s4 }
  0x14   : > { %s1300_s29 = scalar_select %p1084_p6, 1, 0 }
  0x15   : > { %p1291_p8 = pneg %p1084_p6 }
  0x16   : > { %s1082_s28 = scalar_lea.hbm %s1299_s1, %s712_s23  ;;  %s824_s9 = scalar_lea.hbm %s1299_s1, 3072 }
  0x17   : > { %s819_s6 = scalar_lea.hbm %s1082_s28, 1024  ;;  %p825_p11 = scmp.lt.u32.totalorder %s1082_s28, %s1299_s1 }
  0x18   : > { %p820_p7 = scmp.ne.s32.totalorder %s1082_s28, %s819_s6  ;;  %p826_p12 = scmp.lt.u32.totalorder %s824_s9, %s819_s6 }
  0x19   : > { %p828_p0 = scmp.lt.u32.totalorder %s819_s6, %s1082_s28 }
  0x1a   : > { %p822_p9 = pnand %p1291_p8, %p820_p7  ;;  %p827_p13 = por %p826_p12, %p825_p11 }
  0x1c   : > { %p823_p10 = pneg %p822_p9  ;;  %p829_p2 = por %p828_p0, %p827_p13 }
  0x1e   : > { %p830_p3 = pnand %p829_p2, %p823_p10 }
  0x20   : > { %833 = shalt.err (!%p830_p3)
}
  0x21   : > { %s834_s19 = scalar_lea.vmem %s1088_s4, 1024  ;;  %s995_s20 = smov [#allocation6]  }
  0x22   : > { %p835_p4 = scmp.ne.s32.totalorder %s1088_s4, %s834_s19  ;;  %s839_s21 = sshll.u32 %s995_s20, 4  ;;  %s840_s21 = int_to_ptr.vmem [resolvable:$false] %s839_s21 }
  0x23   : > { %s841_s23 = scalar_lea.vmem %s840_s21, 2048  ;;  %p842_p9 = scmp.lt.s32.totalorder %s1088_s4, %s840_s21 }
  0x24   : > { %p837_p5 = pnand %p835_p4, %p1291_p8  ;;  %p843_p11 = scmp.lt.s32.totalorder %s841_s23, %s834_s19 }
  0x26   : > { %p838_p7 = pneg %p837_p5  ;;  %p844_p12 = por %p843_p11, %p842_p9 }
  0x28   : > { %p845_p13 = pnand %p844_p12, %p838_p7 }
  0x2a   : > { %848 = shalt.err (!%p845_p13)
}
  0x2b   : > { %s996_s25 = smov 768   ;;  %s997_s26 = smov 256  }
  0x2c   : > { %s998_s27 = smov 16   ;;  %s1119_s30 = sadd.s32 4294967295, %s993_s17  }
  0x2d   : > { %736 = dma.hbm_to_vmem [thread:$0]  (!%p1084_p6), %s1082_s28, 1024, %s1088_s4, %s1090_s5, %s996_s25, %s997_s26, %s998_s27  }
  0x2e   : > { %s677_s6 = sadd.s32 4294967294, %s993_s17   ;;  %p89_p10 = scmp.ne.s32.totalorder %s977_s13, %s973_s12 }
  0x2f   : > { %p1290_p0 = scmp.eq.s32.totalorder %s1119_s30, 0  ;;  %p141_p2 = scmp.eq.s32.totalorder %s1119_s30, 2 }
  0x30   : > { %p147_p3 = scmp.eq.s32.totalorder %s677_s6, 2  ;;  %p678_p5 = scmp.ge.s32.totalorder %s993_s17, 1 }
  0x31   : > { %p1128_p4 = por %p1290_p0, %p89_p10  ;;  %p1136_p7 = por %p141_p2, %p83_p1 }
  0x32   : > { %p1140_p9 = por %p147_p3, %p89_p10  ;;  %p154_p11 = scmp.lt.s32.totalorder %s993_s17, 4 }
  0x33   : > { %s1301_s7 = scalar_select %p1128_p4, 1, 0 }
  0x34   : > { %s1302_s28 = scalar_select %p1136_p7, 1, 0 }
  0x35   : > { %s1303_s4 = scalar_select %p1140_p9, 1, 0 }
  0x36   : > { %p1145_p12 = pnand %p678_p5, %p154_p11  ;;  %s999_s9 = smov [#allocation3]  }
  0x37   : > { %s170_s10 = sshll.u32 %s999_s9, 4  ;;  %s684_s11 = sshll.u32 %s186_s22, 2  ;;  %s1149_s10 = int_to_ptr.vmem [resolvable:$true] %s170_s10 }
  0x38   : > { %s1304_s8 = scalar_select %p1145_p12, 1, 0 }
  0x39   : > { %p729_p13 = pneg %p1145_p12  ;;  %s713_s19 = sshll.u32 %s989_s16, 6 }
  0x3a   : > { %s1165_s25 = scalar_lea.hbm %s1287_s2, %s713_s19  ;;  %s212_s26 = scalar_lea.vmem [#allocation8], %s684_s11 }
  0x3b   : > { %p1158_p1 = pnand %p729_p13, %p1290_p0  ;;  %s220_s27 = sshll.u32 %s212_s26, 4  ;;  %s1167_s27 = int_to_ptr.vmem [resolvable:$true] %s220_s27 }
  0x3c   : > { %s849_s22 = scalar_lea.hbm %s1285_s0, 128 }
  0x3d   : > { %p850_p10 = scmp.ne.s32.totalorder %s1285_s0, %s849_s22  ;;  %p851_p2 = pneg %p1158_p1 }
  0x3e   : > { %p856_p11 = scmp.lt.u32.totalorder %s849_s22, %s1285_s0 }
  0x3f   : > { %p852_p3 = pnand %p851_p2, %p850_p10 }
  0x41   : > { %p853_p5 = pneg %p852_p3 }
  0x43   : > { %p858_p13 = pnand %p856_p11, %p853_p5 }
  0x45   : > { %861 = shalt.err (!%p858_p13)
}
  0x46   : > { %s862_s11 = scalar_lea.vmem %s1149_s10, 128  ;;  %p870_p7 = scmp.lt.s32.totalorder %s1149_s10, %s1149_s10 }
  0x47   : > { %p863_p0 = scmp.ne.s32.totalorder %s1149_s10, %s862_s11  ;;  %p871_p4 = scmp.lt.s32.totalorder %s862_s11, %s862_s11 }
  0x49   : > { %p865_p8 = pnand %p863_p0, %p851_p2  ;;  %p872_p12 = por %p871_p4, %p870_p7 }
  0x4b   : > { %p866_p9 = pneg %p865_p8 }
  0x4d   : > { %p873_p6 = pnand %p872_p12, %p866_p9 }
  0x4f   : > { %876 = shalt.err (!%p873_p6)
}
  0x50   : > { %s1000_s1 = smov 64   ;;  %s1001_s18 = smov 4  }
  0x51   : > { %732 = dma.hbm_to_vmem [thread:$0]  (!%p1158_p1), %s1285_s0, 128, %s1149_s10, [#allocation4], %s1000_s1, %s1000_s1, %s1001_s18  }
  0x52   : > { %s877_s6 = scalar_lea.hbm %s1165_s25, 64  ;;  %p1306_p0 = scmp.ne.s32.totalorder %s1300_s29, 0 }
  0x53   : > { %p878_p8 = scmp.ne.s32.totalorder %s1165_s25, %s877_s6  ;;  %s882_s21 = scalar_lea.hbm %s1287_s2, 192 }
  0x54   : > { %p1307_p4 = pneg %p1306_p0  ;;  %p883_p9 = scmp.lt.u32.totalorder %s1165_s25, %s1287_s2 }
  0x55   : > { %p884_p12 = scmp.lt.u32.totalorder %s882_s21, %s877_s6  ;;  %p886_p2 = scmp.lt.u32.totalorder %s877_s6, %s1165_s25 }
  0x56   : > { %p880_p7 = pnand %p878_p8, %p1307_p4 }
  0x57   : > { %p885_p10 = por %p884_p12, %p883_p9 }
  0x58   : > { %p881_p6 = pneg %p880_p7 }
  0x59   : > { %p887_p3 = por %p886_p2, %p885_p10 }
  0x5b   : > { %p888_p5 = pnand %p887_p3, %p881_p6 }
  0x5d   : > { %891 = shalt.err (!%p888_p5)
}
  0x5e   : > { %s892_s10 = scalar_lea.vmem %s1167_s27, 64  ;;  %p1308_p11 = pmov %p1307_p4 }
  0x5f   : > { %p893_p1 = scmp.ne.s32.totalorder %s1167_s27, %s892_s10  ;;  %s1002_s20 = smov [#allocation8]  }
  0x60   : > { %s897_s1 = sshll.u32 %s1002_s20, 4  ;;  %s898_s1 = int_to_ptr.vmem [resolvable:$false] %s897_s1 }
  0x61   : > { %p895_p13 = pnand %p893_p1, %p1308_p11  ;;  %s899_s18 = scalar_lea.vmem %s898_s1, 128 }
  0x62   : > { %p900_p4 = scmp.lt.s32.totalorder %s1167_s27, %s898_s1  ;;  %p901_p7 = scmp.lt.s32.totalorder %s899_s18, %s892_s10 }
  0x63   : > { %p896_p8 = pneg %p895_p13 }
  0x64   : > { %p902_p9 = por %p901_p7, %p900_p4 }
  0x66   : > { %p903_p12 = pnand %p902_p9, %p896_p8 }
  0x68   : > { %906 = shalt.err (!%p903_p12)
}
  0x69   : > { %739 = dma.hbm_to_vmem [thread:$0]  (!%p1306_p0), %s1165_s25, 64, %s1167_s27, %s1090_s5  }
  0x6a   : > { %p1309_p6 = scmp.ne.s32.totalorder %s1304_s8, 0 }
  0x6b   : > { %p1310_p10 = scmp.eq.s32.totalorder (!%p1309_p6), %s1119_s30, 0 }
  0x6c   : > { %229 = sbr.rel (%p1309_p6) target bundleno = 366 (0x16e), region = 32 }
  0x73   : > { %960 = dma.done.wait (%p1310_p10), [#allocation4], 128   ;;  %p1311_p2 = pmov %p1310_p10 }
  0x74   : > { %s235_s19 = sand.u32 1, %s1119_s30   ;;  %s1222_s26 = sand.u32 1, %s977_s13  }
  0x75   : > { %962 = vsyncadd (%p1311_p2), [#allocation4], 4294967168  ;;  %s689_s29 = sshll.u32 %s1222_s26, 6  ;;  %s236_s6 = scalar_lea.sflag [#allocation7], %s235_s19 }
  0x76   : > { %s239_s9 = scalar_lea.vmem [#allocation6], %s689_s29  ;;  %p1312_p0 = scmp.ne.s32.totalorder %s1301_s7, 0 }
  0x78   : > { %964 = dma.done.wait (%p1312_p0), %s236_s6, 1088  }
  0x79   : > { %966 = vsyncadd (%p1312_p0), %s236_s6, 4294966208  ;;  %v1003_v0 = vmov 0   ;;  %v806_v1 = vld [vmem:[%s239_s9 + $0x4] ss:$16 sps:$4 sm:$0xff]   ;;  %v808_v2 = vld [vmem:[%s239_s9 + $0xc] ss:$16 sps:$4 sm:$0xff]   ;;  %v477_v10 = vlaneseq }
  0x7a   : > { %394 = vmatprep.mubr.bf16.mxu0 %v1003_v0  ;;  %437 = vmatprep.mubr.bf16.mxu1 %v1003_v0  ;;  %v810_v3 = vld [vmem:[%s239_s9] ss:$16 sps:$4 sm:$0xff]   ;;  %v811_v4 = vld [vmem:[%s239_s9 + $0x8] ss:$16 sps:$4 sm:$0xff]   ;;  %v812_v5 = vld [vmem:[%s239_s9 + $0x24] ss:$16 sps:$4 sm:$0xff]  }
  0x7b   : > { %362 = vmatprep.subr.bf16.mxu0 %v806_v1  ;;  %405 = vmatprep.subr.bf16.mxu1 %v808_v2  ;;  %v814_v6 = vld [vmem:[%s239_s9 + $0x2c] ss:$16 sps:$4 sm:$0xff]   ;;  %v816_v7 = vld [vmem:[%s239_s9 + $0x20] ss:$16 sps:$4 sm:$0xff]   ;;  %v817_v8 = vld [vmem:[%s239_s9 + $0x28] ss:$16 sps:$4 sm:$0xff]  }
  0x7c   : > { %363 = vmatpush1.bf16.msra.mxu0 %v810_v3  ;;  %406 = vmatpush1.bf16.msra.mxu1 %v811_v4  ;;  %v818_v9 = vld [vmem:[#allocation3] sm:$0xff]   ;;  %vm358_vm0 = vcmask 261120   ;;  %s690_s5 = sshll.u32 %s1222_s26, 2  ;;  %v478_v11 = vshrl.u32 %v477_v10, 7  ;;  %s691_s7 = sshll.u32 %s1222_s26, 5 }
  0x7d   : > { %364 = vmatprep.subr.bf16.mxu0 %v812_v5  ;;  %407 = vmatprep.subr.bf16.mxu1 %v814_v6  ;;  %s248_s30 = scalar_lea.vmem [#allocation8], %s690_s5  ;;  %s275_s8 = scalar_lea.vmem [#allocation9], %s691_s7 }
  0x7e   : > { %v479_v12 = vsub.s32 0, %v478_v11  ;;  %v487_v13 = vsub.s32 2, %v478_v11  ;;  %v475_v14 = vld [vmem:[%s248_s30] sm:$0xf]  ;;  %v483_v15 = vsub.s32 1, %v478_v11  ;;  %v491_v16 = vsub.s32 3, %v478_v11 }
  0x7f   : > { %s550_s25 = sshll.u32 %s275_s8, 4  ;;  %s718_s27 = sshll.u32 %s985_s15, 8  ;;  %s1232_s25 = int_to_ptr.vmem [resolvable:$true] %s550_s25 }
  0x80   : > { %365 = vmatpush1.bf16.msra.mxu0 %v816_v7  ;;  %408 = vmatpush1.bf16.msra.mxu1 %v817_v8  ;;  %v480_v17 = vrot.slane %v475_v14, %v479_v12  ;;  %v488_v18 = vrot.slane %v475_v14, %v487_v13  ;;  %v484_v19 = vrot.slane %v475_v14, %v483_v15  ;;  %s1237_s23 = scalar_lea.hbm %s1288_s3, %s718_s27  ;;  %s534_s15 = scalar_lea.sflag [#allocation5], %s1222_s26 }
  0x81   : > { %v492_v20 = vrot.slane %v475_v14, %v491_v16  ;;  %s907_s11 = scalar_lea.vmem %s1232_s25, 512  ;;  %p1313_p5 = scmp.ne.s32.totalorder %s1302_s28, 0 }
  0x82   : > { %p908_p3 = scmp.ne.s32.totalorder %s1232_s25, %s907_s11  ;;  %s1004_s10 = smov [#allocation9]  }
  0x83   : > { %701 = vmatmul.mubr.msk.bf16.vlgmr.msra.gmra.mrb[0].mxu0 %vm358_vm0, %v818_v9  ;;  %702 = vmatmul.mubr.msk.bf16.vlgmr.msra.gmra.mrb[0].mxu1 %vm358_vm0, %v818_v9  ;;  %s911_s20 = sshll.u32 %s1004_s10, 4  ;;  %s912_s20 = int_to_ptr.vmem [resolvable:$false] %s911_s20 }
  0x84   : > { %p909_p1 = pnand %p908_p3, %p1313_p5  ;;  %s913_s1 = scalar_lea.vmem %s912_s20, 1024 }
  0x85   : > { %p914_p13 = scmp.lt.s32.totalorder %s1232_s25, %s912_s20  ;;  %p915_p8 = scmp.lt.s32.totalorder %s913_s1, %s907_s11 }
  0x86   : > { %p910_p11 = pneg %p909_p1 }
  0x87   : > { %p916_p4 = por %p915_p8, %p914_p13 }
  0x89   : > { %p917_p7 = pnand %p916_p4, %p910_p11 }
 0x156   : > { %v396_v21 = vpop.f32.mrb[0].mxu0  ;;  %v439_v22 = vpop.f32.mrb[0].mxu1 }
 0x157   : > { %v497_v23 = vadd.f32 %v480_v17, %v396_v21  ;;  %v499_v24 = vadd.f32 %v488_v18, %v439_v22  ;;  %v398_v25 = vpop.f32.mrb[1].mxu0  ;;  %v441_v26 = vpop.f32.mrb[1].mxu1 }
 0x158   : > { %v498_v27 = vadd.f32 %v484_v19, %v398_v25  ;;  %v500_v28 = vadd.f32 %v492_v20, %v441_v26  ;;  %v400_v29 = vpop.f32.mrb[2].mxu0  ;;  %v443_v30 = vpop.f32.mrb[2].mxu1 }
 0x159   : > { %v501_v31 = vadd.f32 %v480_v17, %v400_v29  ;;  %v503_v32 = vadd.f32 %v488_v18, %v443_v30  ;;  %v402_v33 = vpop.f32.mrb[3].mxu0  ;;  %v445_v34 = vpop.f32.mrb[3].mxu1 }
 0x15a   : > { %v714_v35 = vpack.c.bf16 %v498_v27, %v497_v23  ;;  %v715_v36 = vpack.c.bf16 %v500_v28, %v499_v24  ;;  %v502_v37 = vadd.f32 %v484_v19, %v402_v33  ;;  %v504_v38 = vadd.f32 %v492_v20, %v445_v34 }
 0x15c   : > { %529 = vst [vmem:[%s275_s8] sm:$0xff] %v714_v35  ;;  %530 = vst [vmem:[%s275_s8 + $0x8] sm:$0xff] %v715_v36  ;;  %v716_v39 = vpack.c.bf16 %v502_v37, %v501_v31  ;;  %v717_v40 = vpack.c.bf16 %v504_v38, %v503_v32 }
 0x15e   : > { %531 = vst [vmem:[%s275_s8 + $0x10] sm:$0xff] %v716_v39  ;;  %532 = vst [vmem:[%s275_s8 + $0x18] sm:$0xff] %v717_v40 }
 0x15f   : > { %920 = shalt.err (!%p917_p7)
}
 0x160   : > { %s921_s18 = scalar_lea.hbm %s1237_s23, 512  ;;  %s925_s6 = scalar_lea.hbm %s1288_s3, 1536 }
 0x161   : > { %p922_p9 = scmp.ne.s32.totalorder %s1237_s23, %s921_s18  ;;  %p926_p10 = scmp.lt.u32.totalorder %s1237_s23, %s1288_s3 }
 0x162   : > { %p927_p2 = scmp.lt.u32.totalorder %s925_s6, %s921_s18  ;;  %p929_p3 = scmp.lt.u32.totalorder %s921_s18, %s1237_s23 }
 0x163   : > { %p923_p12 = pnand %p922_p9, %p1313_p5 }
 0x164   : > { %p928_p0 = por %p927_p2, %p926_p10 }
 0x165   : > { %p924_p6 = pneg %p923_p12 }
 0x166   : > { %p930_p1 = por %p929_p3, %p928_p0 }
 0x168   : > { %p931_p11 = pnand %p930_p1, %p924_p6 }
 0x16a   : > { %934 = shalt.err (!%p931_p11)
}
 0x16b   : > { %s1005_s30 = smov 256   ;;  %s1006_s7 = smov 768  }
 0x16c   : > { %s1007_s8 = smov 16  }
 0x16d   : > { %727 = dma.vmem_to_hbm [thread:$0]  (%p1313_p5), %s1232_s25, 512, %s1237_s23, %s534_s15, %s1005_s30, %s1006_s7, %s1007_s8  }
 0x16e PF: > { %p747_p13 = scmp.ge.s32.totalorder %s993_s17, 2  ;;  %s565_s27 = sand.u32 1, %s973_s12  }
 0x16f   : > { %p1314_p8 = scmp.ne.s32.totalorder %s1303_s4, 0  ;;  %s566_s22 = scalar_lea.sflag [#allocation5], %s565_s27 }
 0x171   : > { %p741_p4 = pnand %p747_p13, %p1314_p8 }
 0x173   : > { %968 = dma.done.wait (!%p741_p4), %s566_s22, 512  }
 0x174   : > { %970 = vsyncadd (!%p741_p4), %s566_s22, 4294966784  ;;  %s20_s17 = sadd.s32 1, %s993_s17   ;;  %s1315_s28 = sld [smem:[#allocation13_spill]] }
 0x175   : > { %p17_p7 = scmp.ge.s32.totalorder %s20_s17, 5   ;;  %s1316_s12 = smov %s977_s13 }
 0x176   : > { %s1317_s13 = smov %s981_s14  ;;  %s1318_s14 = smov %s1075_s24 }
 0x177   : > { %s1319_s15 = smov %s989_s16  ;;  %19 = sbr.rel (!%p17_p7) target bundleno = 9 (0x9), region = 102 }
 0x17a   : > { %s1320_s16 = smov %s1315_s28 }
 0x17e   :  { %571 = vsyncpa [#allocation4], 1 }
 0x17f   :  { %573 = vsyncpa [#allocation4 + $0x1], 1 }
 0x180   :  { %574 = vsyncpa [#allocation7], 1 }
 0x181   :  { %576 = vsyncpa [#allocation7 + $0x1], 1 }
 0x182   :  { %577 = vsyncpa [#allocation5], 1 }
 0x183   :  { %579 = vsyncpa [#allocation5 + $0x1], 1 }

</bundles_post_ra>
